<compile_context>
chip_gen: v7x
topology: tpu7x:2x2x1
jax: 0.10.0
libtpu: 0.0.40
codegen_flags: <defaults>
</compile_context>

<pallas_src>
import math
from functools import partial

import jax
import jax.numpy as jnp
from jax import lax
from jax.experimental import pallas as pl
from jax.experimental.pallas import tpu as pltpu

LN_EPS = 1e-5


def _layernorm(x, gamma, beta):
    # Single-pass mean / variance; normalization over the last dim (matches nn.LayerNorm(D)).
    mean = jnp.mean(x, axis=-1, keepdims=True)
    ex2 = jnp.mean(x * x, axis=-1, keepdims=True)
    var = jnp.maximum(ex2 - mean * mean, 0.0)
    inv = lax.rsqrt(var + LN_EPS)
    return (x - mean) * inv * gamma + beta


def _gelu_erf(x):
    # nn.GELU() default = exact erf formulation (VALU polynomial).
    return 0.5 * x * (1.0 + lax.erf(x * (1.0 / math.sqrt(2.0))))


def _gelu_tanh(x):
    # tanh approximation: routes the transcendental to the EUP slot (free when MXU-bound).
    c = 0.7978845608028654  # sqrt(2 / pi)
    return 0.5 * x * (1.0 + jnp.tanh(c * (x + 0.044715 * x * x * x)))


def fnet_fused_kernel(x_ref, scos_ref, ssin_ref, dcos_ref, dsin_ref,
                      ln1g_ref, ln1b_ref, w1_ref, b1_ref, w2_ref, b2_ref,
                      ln2g_ref, ln2b_ref,
                      o_ref,
                      act_ref,
                      *, bt, seq, dim, gelu_approx):
    l = pl.program_id(1)
    n_blocks = pl.num_programs(1)
    m = bt * seq

    # Load the embedded input only for the first encoder block of this batch tile;
    # afterwards the activations live in VMEM (act_ref) across the block grid axis.
    @pl.when(l == 0)
    def _():
        if bt == 1:
            act_ref[...] = x_ref[0]
        else:
            act_ref[...] = x_ref[...].reshape(m, dim)

    x = act_ref[...]                                           # (m, dim) f32
    xb = x.astype(jnp.bfloat16)

    # ---- FourierTransform2D: Re(F_S X F_D) = cosS @ X @ cosD - sinS @ X @ sinD ----
    # D-side DFT: two (m, D) x (D, D) bf16 matmuls (no (m, 2D) temp, no lane slices).
    xc = jnp.dot(xb, dcos_ref[...], preferred_element_type=jnp.float32)   # (m, dim)
    xs = jnp.dot(xb, dsin_ref[...], preferred_element_type=jnp.float32)   # (m, dim)

    # S-side mixing: plain 2-D matmul for bt == 1, batched MXU matmul otherwise
    # (no per-batch-element unroll, no concatenate, no scratch round-trip).
    if bt == 1:
        fourier = (jnp.dot(scos_ref[...], xc.astype(jnp.bfloat16),
                           preferred_element_type=jnp.float32)
                   - jnp.dot(ssin_ref[...], xs.astype(jnp.bfloat16),
                             preferred_element_type=jnp.float32))          # (seq, dim)
    else:
        xc3 = xc.astype(jnp.bfloat16).reshape(bt, seq, dim)
        xs3 = xs.astype(jnp.bfloat16).reshape(bt, seq, dim)
        scos_b = jnp.broadcast_to(scos_ref[...], (bt, seq, seq))
        ssin_b = jnp.broadcast_to(ssin_ref[...], (bt, seq, seq))
        fourier = (jnp.einsum('bpq,bqd->bpd', scos_b, xc3,
                              preferred_element_type=jnp.float32)
                   - jnp.einsum('bpq,bqd->bpd', ssin_b, xs3,
                                preferred_element_type=jnp.float32)).reshape(m, dim)

    # ---- PostLayerNorm #1: LN(fourier(x) + x) ----
    y = _layernorm(fourier + x, ln1g_ref[0, 0], ln1b_ref[0, 0])

    # ---- FeedForwardNetwork: Linear -> GELU -> (Dropout = identity, eval) -> Linear ----
    h = jnp.dot(y.astype(jnp.bfloat16), w1_ref[0],
                preferred_element_type=jnp.float32) + b1_ref[0, 0]          # (m, hid)
    h = _gelu_tanh(h) if gelu_approx else _gelu_erf(h)
    ffn = jnp.dot(h.astype(jnp.bfloat16), w2_ref[0],
                  preferred_element_type=jnp.float32) + b2_ref[0, 0]        # (m, dim)

    # ---- PostLayerNorm #2: LN(ffn(y) + y) ----
    out = _layernorm(ffn + y, ln2g_ref[0, 0], ln2b_ref[0, 0])

    act_ref[...] = out                                         # carry to next encoder block

    @pl.when(l == n_blocks - 1)
    def _():
        if bt == 1:
            o_ref[0] = out
        else:
            o_ref[...] = out.reshape(bt, seq, dim)


def _physical_vmem_bytes():
    try:
        cap = int(getattr(pltpu.get_tpu_info(), "vmem_capacity_bytes", 0))
        if cap > 0:
            return cap
    except Exception:
        pass
    return 64 * 1024 * 1024


def _vmem_estimate_bytes(bt, S, D, H):
    f32, bf16 = 4, 2
    m = bt * S
    io = 2 * 2 * m * D * f32                                   # x + out blocks, double-buffered
    per_block = (D * H + H * D) * bf16 + (H + 5 * D) * f32     # W1/W2 bf16 + b1/b2/LN f32
    params = 2 * per_block                                     # double-buffered per-block params
    dft = 2 * (S * S + D * D) * bf16                           # scos/ssin/dcos/dsin, 1x-buffered
    carry = m * D * f32                                        # act_ref scratch
    temps = (m * H * (f32 + bf16)                              # GELU intermediate h (+ bf16 cast)
             + 6 * m * D * f32                                 # xc, xs, fourier, y, ffn, out
             + 3 * m * D * bf16                                # bf16 casts of activations
             + bt * S * S * bf16)                              # broadcast S-mixing operand
    return io + params + dft + carry + temps


def _vmem_limit_bytes(bt, S, D, H):
    phys = _physical_vmem_bytes()
    usable = int(phys * 0.85)                                  # leave compiler headroom
    est = int(_vmem_estimate_bytes(bt, S, D, H) * 1.5)         # slack for layout/compiler temps
    return min(usable, max(est, 32 * 1024 * 1024))


def _pick_batch_tile(B, S, D, H):
    """Batch elements per grid step: fill the MXU M dim while fitting VMEM and keeping
    >= 2 parallel grid steps when possible (v7x has 2 TensorCores)."""
    phys = _physical_vmem_bytes()
    usable = int(phys * 0.85)
    target_rows = 1024 if phys >= 128 * 1024 * 1024 else 512
    divisors = [d for d in range(1, B + 1) if B % d == 0]
    fits = [d for d in divisors
            if d * S <= max(S, target_rows)
            and int(_vmem_estimate_bytes(d, S, D, H) * 1.5) <= usable]
    bt = max(fits) if fits else 1
    while bt > 1 and B // bt < 2:
        bt = max(d for d in divisors if d < bt)
    return bt


def fnet_encoder_blocks(x, params, dft_mats, *, batch_tile=None, gelu_approximate=True):
    """Run all FNet encoder blocks as a single fused Pallas kernel. x: (B, S, D) f32."""
    B, S, D = x.shape
    L, _, H = params["w1"].shape
    scos, ssin, dcos, dsin = dft_mats
    bt = batch_tile if batch_tile is not None else _pick_batch_tile(B, S, D, H)
    assert B % bt == 0, (B, bt)

    w1 = params["w1"].astype(jnp.bfloat16)   # bf16 MXU operands; f32 accumulation in-kernel
    w2 = params["w2"].astype(jnp.bfloat16)

    def invariant(shape):
        # Grid-invariant operand (constant block index): DMA'd once; single-buffer it to
        # reclaim the second pipeline buffer (matters on v7x's 64 MiB VMEM).
        index_map = lambda i, l: (0, 0)
        try:
            return pl.BlockSpec(shape, index_map, pipeline_mode=pl.Buffered(1))
        except Exception:
            return pl.BlockSpec(shape, index_map)

    def per_block(shape):   # per-encoder-block parameter slabs
        return pl.BlockSpec(shape, lambda i, l: (l, 0, 0))

    kernel = partial(fnet_fused_kernel, bt=bt, seq=S, dim=D, gelu_approx=gelu_approximate)

    return pl.pallas_call(
        kernel,
        out_shape=jax.ShapeDtypeStruct((B, S, D), jnp.float32),
        grid_spec=pltpu.PrefetchScalarGridSpec(
            num_scalar_prefetch=0,
            grid=(B // bt, L),                       # block axis innermost (activation carry)
            in_specs=[
                pl.BlockSpec((bt, S, D), lambda i, l: (i, 0, 0)),   # x (read only at l == 0)
                invariant((S, S)),                                  # cosS
                invariant((S, S)),                                  # sinS
                invariant((D, D)),                                  # cosD
                invariant((D, D)),                                  # sinD
                per_block((1, 1, D)), per_block((1, 1, D)),         # LN1 gamma, beta
                per_block((1, D, H)), per_block((1, 1, H)),         # W1, b1
                per_block((1, H, D)), per_block((1, 1, D)),         # W2, b2
                per_block((1, 1, D)), per_block((1, 1, D)),         # LN2 gamma, beta
            ],
            out_specs=pl.BlockSpec((bt, S, D), lambda i, l: (i, 0, 0)),
            scratch_shapes=[
                pltpu.VMEM((bt * S, D), jnp.float32),   # activation carried across blocks
            ],
        ),
        compiler_params=pltpu.CompilerParams(
            dimension_semantics=("parallel", "arbitrary"),
            vmem_limit_bytes=_vmem_limit_bytes(bt, S, D, H),
        ),
    )(x, scos, ssin, dcos, dsin,
      params["ln1_g"], params["ln1_b"], w1, params["b1"], w2, params["b2"],
      params["ln2_g"], params["ln2_b"])


def fnet_encoder(tokens, params, dft_mats, *, batch_tile=None, gelu_approximate=True):
    # TODO(synk): embedding.Embedding source (pe_type/pooling_type) not provided; using a
    # token-embedding table + learned positional embedding, dropouts as identity (eval).
    B, S = tokens.shape
    x = params["tok_emb"][tokens] + params["pos_emb"][:S][None, :, :]
    return fnet_encoder_blocks(x.astype(jnp.float32), params, dft_mats,
                               batch_tile=batch_tile, gelu_approximate=gelu_approximate)


def make_fourier_mats(S, D, dtype=jnp.bfloat16):
    s = jnp.arange(S, dtype=jnp.float32)
    d = jnp.arange(D, dtype=jnp.float32)
    ang_s = 2.0 * math.pi * jnp.mod(jnp.outer(s, s), S) / S
    ang_d = 2.0 * math.pi * jnp.mod(jnp.outer(d, d), D) / D
    return (jnp.cos(ang_s).astype(dtype), jnp.sin(ang_s).astype(dtype),
            jnp.cos(ang_d).astype(dtype), jnp.sin(ang_d).astype(dtype))


def init_params(key, num_block, D, H, vocab_size, max_seq_len):
    keys = jax.random.split(key, 2 + num_block)
    w1s, b1s, w2s, b2s = [], [], [], []
    for i in range(num_block):
        k1, k2, k3, k4 = jax.random.split(keys[2 + i], 4)
        # kaiming_normal(fan_in, leaky_relu a=0): std = sqrt(2 / fan_in); stored (in, out)
        w1s.append(jax.random.normal(k1, (D, H), jnp.float32) * math.sqrt(2.0 / D))
        w2s.append(jax.random.normal(k2, (H, D), jnp.float32) * math.sqrt(2.0 / H))
        # nn.Linear default bias init: U(-1/sqrt(fan_in), 1/sqrt(fan_in))
        b1s.append((jax.random.uniform(k3, (1, H), jnp.float32) * 2.0 - 1.0) / math.sqrt(D))
        b2s.append((jax.random.uniform(k4, (1, D), jnp.float32) * 2.0 - 1.0) / math.sqrt(H))
    return {
        "tok_emb": jax.random.normal(keys[0], (vocab_size, D), jnp.float32) * 0.02,
        "pos_emb": jax.random.normal(keys[1], (max_seq_len, D), jnp.float32) * 0.02,
        "ln1_g": jnp.ones((num_block, 1, D), jnp.float32),
        "ln1_b": jnp.zeros((num_block, 1, D), jnp.float32),
        "w1": jnp.stack(w1s), "b1": jnp.stack(b1s),
        "w2": jnp.stack(w2s), "b2": jnp.stack(b2s),
        "ln2_g": jnp.ones((num_block, 1, D), jnp.float32),
        "ln2_b": jnp.zeros((num_block, 1, D), jnp.float32),
    }


def _reference_forward(x, params, num_block):
    # Pure-JAX reference (float32, exact fft2, exact-erf GELU) for structural self-validation.
    def ln(v, g, b):
        mu = jnp.mean(v, axis=-1, keepdims=True)
        var = jnp.mean((v - mu) ** 2, axis=-1, keepdims=True)
        return (v - mu) * lax.rsqrt(var + LN_EPS) * g + b

    out = x
    for l in range(num_block):
        four = jnp.fft.fft2(out, axes=(-2, -1)).real
        out = ln(four + out, params["ln1_g"][l], params["ln1_b"][l])
        h = out @ params["w1"][l] + params["b1"][l]
        h = 0.5 * h * (1.0 + lax.erf(h / math.sqrt(2.0)))
        ffn = h @ params["w2"][l] + params["b2"][l]
        out = ln(ffn + out, params["ln2_g"][l], params["ln2_b"][l])
    return out


if __name__ == "__main__":
    B, S, D, H = 2, 8, 32, 64
    VOCAB, MAX_SEQ, NUM_BLOCK = 50, 16, 2

    key = jax.random.PRNGKey(0)
    k_tok, k_par = jax.random.split(key)
    tokens = jax.random.randint(k_tok, (B, S), 0, VOCAB, dtype=jnp.int32)
    params = init_params(k_par, NUM_BLOCK, D, H, VOCAB, MAX_SEQ)
    dft_mats = make_fourier_mats(S, D)

    out = jax.jit(fnet_encoder)(tokens, params, dft_mats)
    jax.block_until_ready(out)
    assert out.shape == (B, S, D)

    # Loose structural check against a pure-JAX f32 reference
    # (bf16 matmuls + tanh-GELU => ~1-2% relative error budget).
    x_emb = (params["tok_emb"][tokens] + params["pos_emb"][:S][None, :, :]).astype(jnp.float32)
    ref = _reference_forward(x_emb, params, NUM_BLOCK)
    rel_err = float(jnp.linalg.norm(out - ref) / jnp.linalg.norm(ref))
    assert rel_err < 0.1, f"kernel vs reference rel_err={rel_err:.4f}"

    print("KERNEL_OK")
</pallas_src>

<mosaic_0001>
module attributes {stable_mosaic.version = 11 : i64} {
  func.func @fnet_fused_kernel(%arg0: i32, %arg1: i32, %arg2: memref<1x8x32xf32, #tpu.memory_space<vmem>>, %arg3: memref<8x8xbf16, #tpu.memory_space<vmem>>, %arg4: memref<8x8xbf16, #tpu.memory_space<vmem>>, %arg5: memref<32x32xbf16, #tpu.memory_space<vmem>>, %arg6: memref<32x32xbf16, #tpu.memory_space<vmem>>, %arg7: memref<1x1x32xf32, #tpu.memory_space<vmem>>, %arg8: memref<1x1x32xf32, #tpu.memory_space<vmem>>, %arg9: memref<1x32x64xbf16, #tpu.memory_space<vmem>>, %arg10: memref<1x1x64xf32, #tpu.memory_space<vmem>>, %arg11: memref<1x64x32xbf16, #tpu.memory_space<vmem>>, %arg12: memref<1x1x32xf32, #tpu.memory_space<vmem>>, %arg13: memref<1x1x32xf32, #tpu.memory_space<vmem>>, %arg14: memref<1x1x32xf32, #tpu.memory_space<vmem>>, %arg15: memref<1x8x32xf32, #tpu.memory_space<vmem>>, %arg16: memref<8x32xf32, #tpu.memory_space<vmem>>) attributes {dimension_semantics = [#tpu.dimension_semantics<parallel>, #tpu.dimension_semantics<arbitrary>], iteration_bounds = array<i64: 2, 2>, scalar_prefetch = 0 : i64, scratch_operands = 1 : i64, tpu.core_type = #tpu.core_type<tc>, window_params = [{transform_indices = @transform_0, window_bounds = array<i64: 1, 8, 32>}, {pipeline_mode = #tpu.pipeline_mode<synchronous>, transform_indices = @transform_1, window_bounds = array<i64: 8, 8>}, {pipeline_mode = #tpu.pipeline_mode<synchronous>, transform_indices = @transform_2, window_bounds = array<i64: 8, 8>}, {pipeline_mode = #tpu.pipeline_mode<synchronous>, transform_indices = @transform_3, window_bounds = array<i64: 32, 32>}, {pipeline_mode = #tpu.pipeline_mode<synchronous>, transform_indices = @transform_4, window_bounds = array<i64: 32, 32>}, {transform_indices = @transform_5, window_bounds = array<i64: 1, 1, 32>}, {transform_indices = @transform_6, window_bounds = array<i64: 1, 1, 32>}, {transform_indices = @transform_7, window_bounds = array<i64: 1, 32, 64>}, {transform_indices = @transform_8, window_bounds = array<i64: 1, 1, 64>}, {transform_indices = @transform_9, window_bounds = array<i64: 1, 64, 32>}, {transform_indices = @transform_10, window_bounds = array<i64: 1, 1, 32>}, {transform_indices = @transform_11, window_bounds = array<i64: 1, 1, 32>}, {transform_indices = @transform_12, window_bounds = array<i64: 1, 1, 32>}, {transform_indices = @transform_13, window_bounds = array<i64: 1, 8, 32>}]} {
    %c0_i32 = arith.constant 0 : i32
    %0 = arith.cmpi eq, %arg1, %c0_i32 : i32
    %1 = arith.extui %0 : i1 to i32
    %c0_i32_0 = arith.constant 0 : i32
    %2 = arith.cmpi ne, %1, %c0_i32_0 : i32
    scf.if %2 {
      %c0_58 = arith.constant 0 : index
      %c0_59 = arith.constant 0 : index
      %c0_60 = arith.constant 0 : index
      %113 = vector.load %arg2[%c0_58, %c0_59, %c0_60] : memref<1x8x32xf32, #tpu.memory_space<vmem>>, vector<1x8x32xf32>
      %114 = vector.shape_cast %113 : vector<1x8x32xf32> to vector<8x32xf32>
      %c0_61 = arith.constant 0 : index
      %c0_62 = arith.constant 0 : index
      %115 = vector.load %arg16[%c0_61, %c0_62] : memref<8x32xf32, #tpu.memory_space<vmem>>, vector<8x32xf32>
      tpu.vector_store %arg16[%c0_61, %c0_62], %114 {strides = array<i32>} : memref<8x32xf32, #tpu.memory_space<vmem>>, vector<8x32xf32>,
    } else {
    }
    %c0 = arith.constant 0 : index
    %c0_1 = arith.constant 0 : index
    %3 = vector.load %arg16[%c0, %c0_1] : memref<8x32xf32, #tpu.memory_space<vmem>>, vector<8x32xf32>
    %4 = arith.truncf %3 : vector<8x32xf32> to vector<8x32xbf16>
    %c0_2 = arith.constant 0 : index
    %c0_3 = arith.constant 0 : index
    %5 = vector.load %arg5[%c0_2, %c0_3] : memref<32x32xbf16, #tpu.memory_space<vmem>>, vector<32x32xbf16>
    %cst = arith.constant dense<0.000000e+00> : vector<8x32xf32>
    %6 = tpu.matmul %4, %5, %cst {dimension_numbers = #tpu.dot_dimension_numbers<[1], [0], [0], [1], [0, 0, 1, 1], [], []>} : vector<8x32xbf16>, vector<32x32xbf16>, vector<8x32xf32> -> vector<8x32xf32>
    %c0_4 = arith.constant 0 : index
    %c0_5 = arith.constant 0 : index
    %7 = vector.load %arg6[%c0_4, %c0_5] : memref<32x32xbf16, #tpu.memory_space<vmem>>, vector<32x32xbf16>
    %cst_6 = arith.constant dense<0.000000e+00> : vector<8x32xf32>
    %8 = tpu.matmul %4, %7, %cst_6 {dimension_numbers = #tpu.dot_dimension_numbers<[1], [0], [0], [1], [0, 0, 1, 1], [], []>} : vector<8x32xbf16>, vector<32x32xbf16>, vector<8x32xf32> -> vector<8x32xf32>
    %c0_7 = arith.constant 0 : index
    %c0_8 = arith.constant 0 : index
    %9 = vector.load %arg3[%c0_7, %c0_8] : memref<8x8xbf16, #tpu.memory_space<vmem>>, vector<8x8xbf16>
    %10 = arith.truncf %6 : vector<8x32xf32> to vector<8x32xbf16>
    %cst_9 = arith.constant dense<0.000000e+00> : vector<8x32xf32>
    %11 = tpu.matmul %9, %10, %cst_9 {dimension_numbers = #tpu.dot_dimension_numbers<[1], [0], [0], [1], [0, 0, 1, 1], [], []>} : vector<8x8xbf16>, vector<8x32xbf16>, vector<8x32xf32> -> vector<8x32xf32>
    %c0_10 = arith.constant 0 : index
    %c0_11 = arith.constant 0 : index
    %12 = vector.load %arg4[%c0_10, %c0_11] : memref<8x8xbf16, #tpu.memory_space<vmem>>, vector<8x8xbf16>
    %13 = arith.truncf %8 : vector<8x32xf32> to vector<8x32xbf16>
    %cst_12 = arith.constant dense<0.000000e+00> : vector<8x32xf32>
    %14 = tpu.matmul %12, %13, %cst_12 {dimension_numbers = #tpu.dot_dimension_numbers<[1], [0], [0], [1], [0, 0, 1, 1], [], []>} : vector<8x8xbf16>, vector<8x32xbf16>, vector<8x32xf32> -> vector<8x32xf32>
    %15 = arith.subf %11, %14 : vector<8x32xf32>
    %16 = arith.addf %15, %3 : vector<8x32xf32>
    %c0_13 = arith.constant 0 : index
    %c0_14 = arith.constant 0 : index
    %c0_15 = arith.constant 0 : index
    %17 = vector.load %arg7[%c0_13, %c0_14, %c0_15] : memref<1x1x32xf32, #tpu.memory_space<vmem>>, vector<1x1x32xf32>
    %18 = vector.shape_cast %17 : vector<1x1x32xf32> to vector<32xf32>
    %c0_16 = arith.constant 0 : index
    %c0_17 = arith.constant 0 : index
    %c0_18 = arith.constant 0 : index
    %19 = vector.load %arg8[%c0_16, %c0_17, %c0_18] : memref<1x1x32xf32, #tpu.memory_space<vmem>>, vector<1x1x32xf32>
    %20 = vector.shape_cast %19 : vector<1x1x32xf32> to vector<32xf32>
    %cst_19 = arith.constant dense<0.000000e+00> : vector<8xf32>
    %21 = vector.multi_reduction <add>, %16, %cst_19 [1] : vector<8x32xf32> to vector<8xf32>
    %22 = vector.shape_cast %21 : vector<8xf32> to vector<8x1xf32>
    %cst_20 = arith.constant 3.200000e+01 : f32
    %23 = vector.broadcast %cst_20 : f32 to vector<8x1xf32>
    %24 = arith.divf %22, %23 : vector<8x1xf32>
    %25 = arith.mulf %16, %16 : vector<8x32xf32>
    %cst_21 = arith.constant dense<0.000000e+00> : vector<8xf32>
    %26 = vector.multi_reduction <add>, %25, %cst_21 [1] : vector<8x32xf32> to vector<8xf32>
    %27 = vector.shape_cast %26 : vector<8xf32> to vector<8x1xf32>
    %cst_22 = arith.constant 3.200000e+01 : f32
    %28 = vector.broadcast %cst_22 : f32 to vector<8x1xf32>
    %29 = arith.divf %27, %28 : vector<8x1xf32>
    %30 = arith.mulf %24, %24 : vector<8x1xf32>
    %31 = arith.subf %29, %30 : vector<8x1xf32>
    %cst_23 = arith.constant 0.000000e+00 : f32
    %32 = vector.broadcast %cst_23 : f32 to vector<8x1xf32>
    %33 = arith.maximumf %31, %32 : vector<8x1xf32>
    %cst_24 = arith.constant 9.99999974E-6 : f32
    %34 = vector.broadcast %cst_24 : f32 to vector<8x1xf32>
    %35 = arith.addf %33, %34 : vector<8x1xf32>
    %36 = math.rsqrt %35 : vector<8x1xf32>
    %37 = vector.broadcast %24 : vector<8x1xf32> to vector<8x32xf32>
    %38 = arith.subf %16, %37 : vector<8x32xf32>
    %39 = vector.broadcast %36 : vector<8x1xf32> to vector<8x32xf32>
    %40 = arith.mulf %38, %39 : vector<8x32xf32>
    %41 = vector.shape_cast %18 : vector<32xf32> to vector<1x32xf32>
    %42 = vector.broadcast %41 : vector<1x32xf32> to vector<8x32xf32>
    %43 = arith.mulf %40, %42 : vector<8x32xf32>
    %44 = vector.shape_cast %20 : vector<32xf32> to vector<1x32xf32>
    %45 = vector.broadcast %44 : vector<1x32xf32> to vector<8x32xf32>
    %46 = arith.addf %43, %45 : vector<8x32xf32>
    %47 = arith.truncf %46 : vector<8x32xf32> to vector<8x32xbf16>
    %c0_25 = arith.constant 0 : index
    %c0_26 = arith.constant 0 : index
    %c0_27 = arith.constant 0 : index
    %48 = vector.load %arg9[%c0_25, %c0_26, %c0_27] : memref<1x32x64xbf16, #tpu.memory_space<vmem>>, vector<1x32x64xbf16>
    %49 = vector.shape_cast %48 : vector<1x32x64xbf16> to vector<32x64xbf16>
    %cst_28 = arith.constant dense<0.000000e+00> : vector<8x64xf32>
    %50 = tpu.matmul %47, %49, %cst_28 {dimension_numbers = #tpu.dot_dimension_numbers<[1], [0], [0], [1], [0, 0, 1, 1], [], []>} : vector<8x32xbf16>, vector<32x64xbf16>, vector<8x64xf32> -> vector<8x64xf32>
    %c0_29 = arith.constant 0 : index
    %c0_30 = arith.constant 0 : index
    %c0_31 = arith.constant 0 : index
    %51 = vector.load %arg10[%c0_29, %c0_30, %c0_31] : memref<1x1x64xf32, #tpu.memory_space<vmem>>, vector<1x1x64xf32>
    %52 = vector.shape_cast %51 : vector<1x1x64xf32> to vector<64xf32>
    %53 = vector.shape_cast %52 : vector<64xf32> to vector<1x64xf32>
    %54 = vector.broadcast %53 : vector<1x64xf32> to vector<8x64xf32>
    %55 = arith.addf %50, %54 : vector<8x64xf32>
    %cst_32 = arith.constant 5.000000e-01 : f32
    %56 = vector.broadcast %cst_32 : f32 to vector<8x64xf32>
    %57 = arith.mulf %56, %55 : vector<8x64xf32>
    %cst_33 = arith.constant 4.471500e-02 : f32
    %58 = vector.broadcast %cst_33 : f32 to vector<8x64xf32>
    %59 = arith.mulf %58, %55 : vector<8x64xf32>
    %60 = arith.mulf %59, %55 : vector<8x64xf32>
    %61 = arith.mulf %60, %55 : vector<8x64xf32>
    %62 = arith.addf %55, %61 : vector<8x64xf32>
    %cst_34 = arith.constant 0.797884583 : f32
    %63 = vector.broadcast %cst_34 : f32 to vector<8x64xf32>
    %64 = arith.mulf %63, %62 : vector<8x64xf32>
    %65 = math.tanh %64 : vector<8x64xf32>
    %cst_35 = arith.constant 1.000000e+00 : f32
    %66 = vector.broadcast %cst_35 : f32 to vector<8x64xf32>
    %67 = arith.addf %66, %65 : vector<8x64xf32>
    %68 = arith.mulf %57, %67 : vector<8x64xf32>
    %69 = arith.truncf %68 : vector<8x64xf32> to vector<8x64xbf16>
    %c0_36 = arith.constant 0 : index
    %c0_37 = arith.constant 0 : index
    %c0_38 = arith.constant 0 : index
    %70 = vector.load %arg11[%c0_36, %c0_37, %c0_38] : memref<1x64x32xbf16, #tpu.memory_space<vmem>>, vector<1x64x32xbf16>
    %71 = vector.shape_cast %70 : vector<1x64x32xbf16> to vector<64x32xbf16>
    %cst_39 = arith.constant dense<0.000000e+00> : vector<8x32xf32>
    %72 = tpu.matmul %69, %71, %cst_39 {dimension_numbers = #tpu.dot_dimension_numbers<[1], [0], [0], [1], [0, 0, 1, 1], [], []>} : vector<8x64xbf16>, vector<64x32xbf16>, vector<8x32xf32> -> vector<8x32xf32>
    %c0_40 = arith.constant 0 : index
    %c0_41 = arith.constant 0 : index
    %c0_42 = arith.constant 0 : index
    %73 = vector.load %arg12[%c0_40, %c0_41, %c0_42] : memref<1x1x32xf32, #tpu.memory_space<vmem>>, vector<1x1x32xf32>
    %74 = vector.shape_cast %73 : vector<1x1x32xf32> to vector<32xf32>
    %75 = vector.shape_cast %74 : vector<32xf32> to vector<1x32xf32>
    %76 = vector.broadcast %75 : vector<1x32xf32> to vector<8x32xf32>
    %77 = arith.addf %72, %76 : vector<8x32xf32>
    %78 = arith.addf %77, %46 : vector<8x32xf32>
    %c0_43 = arith.constant 0 : index
    %c0_44 = arith.constant 0 : index
    %c0_45 = arith.constant 0 : index
    %79 = vector.load %arg13[%c0_43, %c0_44, %c0_45] : memref<1x1x32xf32, #tpu.memory_space<vmem>>, vector<1x1x32xf32>
    %80 = vector.shape_cast %79 : vector<1x1x32xf32> to vector<32xf32>
    %c0_46 = arith.constant 0 : index
    %c0_47 = arith.constant 0 : index
    %c0_48 = arith.constant 0 : index
    %81 = vector.load %arg14[%c0_46, %c0_47, %c0_48] : memref<1x1x32xf32, #tpu.memory_space<vmem>>, vector<1x1x32xf32>
    %82 = vector.shape_cast %81 : vector<1x1x32xf32> to vector<32xf32>
    %cst_49 = arith.constant dense<0.000000e+00> : vector<8xf32>
    %83 = vector.multi_reduction <add>, %78, %cst_49 [1] : vector<8x32xf32> to vector<8xf32>
    %84 = vector.shape_cast %83 : vector<8xf32> to vector<8x1xf32>
    %cst_50 = arith.constant 3.200000e+01 : f32
    %85 = vector.broadcast %cst_50 : f32 to vector<8x1xf32>
    %86 = arith.divf %84, %85 : vector<8x1xf32>
    %87 = arith.mulf %78, %78 : vector<8x32xf32>
    %cst_51 = arith.constant dense<0.000000e+00> : vector<8xf32>
    %88 = vector.multi_reduction <add>, %87, %cst_51 [1] : vector<8x32xf32> to vector<8xf32>
    %89 = vector.shape_cast %88 : vector<8xf32> to vector<8x1xf32>
    %cst_52 = arith.constant 3.200000e+01 : f32
    %90 = vector.broadcast %cst_52 : f32 to vector<8x1xf32>
    %91 = arith.divf %89, %90 : vector<8x1xf32>
    %92 = arith.mulf %86, %86 : vector<8x1xf32>
    %93 = arith.subf %91, %92 : vector<8x1xf32>
    %cst_53 = arith.constant 0.000000e+00 : f32
    %94 = vector.broadcast %cst_53 : f32 to vector<8x1xf32>
    %95 = arith.maximumf %93, %94 : vector<8x1xf32>
    %cst_54 = arith.constant 9.99999974E-6 : f32
    %96 = vector.broadcast %cst_54 : f32 to vector<8x1xf32>
    %97 = arith.addf %95, %96 : vector<8x1xf32>
    %98 = math.rsqrt %97 : vector<8x1xf32>
    %99 = vector.broadcast %86 : vector<8x1xf32> to vector<8x32xf32>
    %100 = arith.subf %78, %99 : vector<8x32xf32>
    %101 = vector.broadcast %98 : vector<8x1xf32> to vector<8x32xf32>
    %102 = arith.mulf %100, %101 : vector<8x32xf32>
    %103 = vector.shape_cast %80 : vector<32xf32> to vector<1x32xf32>
    %104 = vector.broadcast %103 : vector<1x32xf32> to vector<8x32xf32>
    %105 = arith.mulf %102, %104 : vector<8x32xf32>
    %106 = vector.shape_cast %82 : vector<32xf32> to vector<1x32xf32>
    %107 = vector.broadcast %106 : vector<1x32xf32> to vector<8x32xf32>
    %108 = arith.addf %105, %107 : vector<8x32xf32>
    %c0_55 = arith.constant 0 : index
    %c0_56 = arith.constant 0 : index
    %109 = vector.load %arg16[%c0_55, %c0_56] : memref<8x32xf32, #tpu.memory_space<vmem>>, vector<8x32xf32>
    tpu.vector_store %arg16[%c0_55, %c0_56], %108 {strides = array<i32>} : memref<8x32xf32, #tpu.memory_space<vmem>>, vector<8x32xf32>,
    %c1_i32 = arith.constant 1 : i32
    %110 = arith.cmpi eq, %arg1, %c1_i32 : i32
    %111 = arith.extui %110 : i1 to i32
    %c0_i32_57 = arith.constant 0 : i32
    %112 = arith.cmpi ne, %111, %c0_i32_57 : i32
    scf.if %112 {
      %c0_58 = arith.constant 0 : index
      %c0_59 = arith.constant 0 : index
      %c0_60 = arith.constant 0 : index
      %113 = vector.load %arg15[%c0_58, %c0_59, %c0_60] : memref<1x8x32xf32, #tpu.memory_space<vmem>>, vector<1x8x32xf32>
      %114 = vector.shape_cast %113 : vector<1x8x32xf32> to vector<8x32xf32>
      %115 = vector.shape_cast %108 : vector<8x32xf32> to vector<1x8x32xf32>
      tpu.vector_store %arg15[%c0_58, %c0_59, %c0_60], %115 {strides = array<i32>} : memref<1x8x32xf32, #tpu.memory_space<vmem>>, vector<1x8x32xf32>,
    } else {
    }
    return
  }
  func.func @transform_0(%arg0: i32, %arg1: i32) -> (i32, i32, i32) {
    %c0_i32 = arith.constant 0 : i32
    %c0_i32_0 = arith.constant 0 : i32
    %c0_i32_1 = arith.constant 0 : i32
    return %arg0, %c0_i32, %c0_i32_0 : i32, i32, i32
  }
  func.func @transform_1(%arg0: i32, %arg1: i32) -> (i32, i32) {
    %c0_i32 = arith.constant 0 : i32
    %c0_i32_0 = arith.constant 0 : i32
    %c0_i32_1 = arith.constant 0 : i32
    return %c0_i32, %c0_i32_0 : i32, i32
  }
  func.func @transform_2(%arg0: i32, %arg1: i32) -> (i32, i32) {
    %c0_i32 = arith.constant 0 : i32
    %c0_i32_0 = arith.constant 0 : i32
    %c0_i32_1 = arith.constant 0 : i32
    return %c0_i32, %c0_i32_0 : i32, i32
  }
  func.func @transform_3(%arg0: i32, %arg1: i32) -> (i32, i32) {
    %c0_i32 = arith.constant 0 : i32
    %c0_i32_0 = arith.constant 0 : i32
    %c0_i32_1 = arith.constant 0 : i32
    return %c0_i32, %c0_i32_0 : i32, i32
  }
  func.func @transform_4(%arg0: i32, %arg1: i32) -> (i32, i32) {
    %c0_i32 = arith.constant 0 : i32
    %c0_i32_0 = arith.constant 0 : i32
    %c0_i32_1 = arith.constant 0 : i32
    return %c0_i32, %c0_i32_0 : i32, i32
  }
  func.func @transform_5(%arg0: i32, %arg1: i32) -> (i32, i32, i32) {
    %c0_i32 = arith.constant 0 : i32
    %c0_i32_0 = arith.constant 0 : i32
    %c0_i32_1 = arith.constant 0 : i32
    return %arg1, %c0_i32, %c0_i32_0 : i32, i32, i32
  }
  func.func @transform_6(%arg0: i32, %arg1: i32) -> (i32, i32, i32) {
    %c0_i32 = arith.constant 0 : i32
    %c0_i32_0 = arith.constant 0 : i32
    %c0_i32_1 = arith.constant 0 : i32
    return %arg1, %c0_i32, %c0_i32_0 : i32, i32, i32
  }
  func.func @transform_7(%arg0: i32, %arg1: i32) -> (i32, i32, i32) {
    %c0_i32 = arith.constant 0 : i32
    %c0_i32_0 = arith.constant 0 : i32
    %c0_i32_1 = arith.constant 0 : i32
    return %arg1, %c0_i32, %c0_i32_0 : i32, i32, i32
  }
  func.func @transform_8(%arg0: i32, %arg1: i32) -> (i32, i32, i32) {
    %c0_i32 = arith.constant 0 : i32
    %c0_i32_0 = arith.constant 0 : i32
    %c0_i32_1 = arith.constant 0 : i32
    return %arg1, %c0_i32, %c0_i32_0 : i32, i32, i32
  }
  func.func @transform_9(%arg0: i32, %arg1: i32) -> (i32, i32, i32) {
    %c0_i32 = arith.constant 0 : i32
    %c0_i32_0 = arith.constant 0 : i32
    %c0_i32_1 = arith.constant 0 : i32
    return %arg1, %c0_i32, %c0_i32_0 : i32, i32, i32
  }
  func.func @transform_10(%arg0: i32, %arg1: i32) -> (i32, i32, i32) {
    %c0_i32 = arith.constant 0 : i32
    %c0_i32_0 = arith.constant 0 : i32
    %c0_i32_1 = arith.constant 0 : i32
    return %arg1, %c0_i32, %c0_i32_0 : i32, i32, i32
  }
  func.func @transform_11(%arg0: i32, %arg1: i32) -> (i32, i32, i32) {
    %c0_i32 = arith.constant 0 : i32
    %c0_i32_0 = arith.constant 0 : i32
    %c0_i32_1 = arith.constant 0 : i32
    return %arg1, %c0_i32, %c0_i32_0 : i32, i32, i32
  }
  func.func @transform_12(%arg0: i32, %arg1: i32) -> (i32, i32, i32) {
    %c0_i32 = arith.constant 0 : i32
    %c0_i32_0 = arith.constant 0 : i32
    %c0_i32_1 = arith.constant 0 : i32
    return %arg1, %c0_i32, %c0_i32_0 : i32, i32, i32
  }
  func.func @transform_13(%arg0: i32, %arg1: i32) -> (i32, i32, i32) {
    %c0_i32 = arith.constant 0 : i32
    %c0_i32_0 = arith.constant 0 : i32
    %c0_i32_1 = arith.constant 0 : i32
    return %arg0, %c0_i32, %c0_i32_0 : i32, i32, i32
  }
}

</mosaic_0001>

<bundles_post_ra>
// kernel: fnet_encoder.1
= control target key start
LH: loop header
LB: loop body
LE: loop exit
PB: predicated region body
PF: predicated region fallthrough
CT: control target
= control target key end

     0   :  { %s1823_s0 = inlined_call_operand.vmem [shape: f32[2,8,32], index: 0, kind: input, shape index: {}]   ;;  %s1824_s1 = inlined_call_operand.vmem [shape: bf16[8,8], index: 1, kind: input, shape index: {}]   ;;  %s1825_s2 = inlined_call_operand.vmem [shape: bf16[8,8], index: 2, kind: input, shape index: {}]   ;;  %s1826_s3 = inlined_call_operand.vmem [shape: bf16[32,32], index: 3, kind: input, shape index: {}]   ;;  %s1827_s4 = inlined_call_operand.vmem [shape: bf16[32,32], index: 4, kind: input, shape index: {}]   ;;  %s1828_s5 = inlined_call_operand.vmem [shape: f32[2,1,32], index: 5, kind: input, shape index: {}]   ;;  %s1829_s6 = inlined_call_operand.vmem [shape: f32[2,1,32], index: 6, kind: input, shape index: {}]   ;;  %s1830_s7 = inlined_call_operand.vmem [shape: bf16[2,32,64], index: 7, kind: input, shape index: {}]   ;;  %s1831_s8 = inlined_call_operand.vmem [shape: f32[2,1,64], index: 8, kind: input, shape index: {}]   ;;  %s1832_s9 = inlined_call_operand.vmem [shape: bf16[2,64,32], index: 9, kind: input, shape index: {}]   ;;  %s1833_s10 = inlined_call_operand.vmem [shape: f32[2,1,32], index: 10, kind: input, shape index: {}]   ;;  %s1834_s11 = inlined_call_operand.vmem [shape: f32[2,1,32], index: 11, kind: input, shape index: {}]   ;;  %s1835_s12 = inlined_call_operand.vmem [shape: f32[2,1,32], index: 12, kind: input, shape index: {}]   ;;  %s1836_s13 = inlined_call_operand.hbm [shape: f32[2,8,32], index: 13, kind: output, shape index: {}]  }
   0x1   :  { %1851 = sst [smem:[#allocation18_spill]] %s1823_s0 }
   0x2   :  { %1852 = sst [smem:[#allocation19_spill]] %s1824_s1 }
   0x3   :  { %1853 = sst [smem:[#allocation20_spill]] %s1825_s2 }
   0x4   :  { %1854 = sst [smem:[#allocation21_spill]] %s1836_s13 }
   0x5   :  { %18 = vsyncpa [#allocation4], 0 }
   0x6   :  { %20 = vsyncpa [#allocation4 + $0x1], 0  ;;  %s1557_s25 = smov 0   ;;  %s1559_s26 = smov 0  }
   0x7   :  { %s1561_s27 = smov 0   ;;  %s1563_s28 = smov 0  }
   0x8   :  { %s1565_s29 = smov 0   ;;  %s1567_s30 = smov 0  }
   0x9   :  { %s1569_s14 = smov 0   ;;  %s1571_s15 = smov 0  }
   0xa LB: > { %1855 = sst [smem:[#allocation6_spill]] %s1454_s25  ;;  %s1192_s16 = sadd.s32 4294967295, %s1482_s15   ;;  %s1482_s15 = sphi %s1571_s15, %s26_s15   ;;  %s1478_s14 = sphi %s1569_s14, %s1888_s14   ;;  %s1474_s30 = sphi %s1567_s30, %s1887_s30   ;;  %s1470_s29 = sphi %s1565_s29, %s1886_s29   ;;  %s1466_s28 = sphi %s1563_s28, %s1885_s28   ;;  %s1462_s27 = sphi %s1561_s27, %s1884_s27   ;;  %s1458_s26 = sphi %s1559_s26, %s1883_s26   ;;  %s1454_s25 = sphi %s1557_s25, %s1882_s25  }
   0xb   : > { %1856 = sst [smem:[#allocation7_spill]] %s1458_s26  ;;  %s1193_s17 = sadd.s32 4294967294, %s1482_s15  }
   0xc   : > { %1857 = sst [smem:[#allocation8_spill]] %s1462_s27  ;;  %s35_s18 = sadd.s32 1, %s1474_s30 }
   0xd   : > { %1858 = sst [smem:[#allocation9_spill]] %s1470_s29  ;;  %p36_p0 = scmp.ge.s32.totalorder %s35_s18, 2 }
   0xe   : > { %1859 = sst [smem:[#allocation10_spill]] %s1474_s30  ;;  %s38_s19 = sadd.s32 1, %s1478_s14 }
   0xf   : > { %1860 = sst [smem:[#allocation11_spill]] %s1478_s14  ;;  %p373_p1 = scmp.ne.s32.totalorder %s1462_s27, %s1458_s26 }
  0x10   : > { %1861 = sst [smem:[#allocation12_spill]] %s1482_s15  ;;  %p374_p2 = scmp.eq.s32.totalorder %s1192_s16, 3 }
  0x11   : > { %s1890_s18 = smov (%p36_p0, %s35_s18), 0  ;;  %s1892_s19 = smov (!%p36_p0, %s38_s19), %s1478_s14 }
  0x12   : > { %1862 = sst [smem:[#allocation13_spill]] %s1890_s18  ;;  %p1606_p3 = por %p374_p2, %p373_p1 }
  0x13   : > { %p379_p4 = scmp.ne.s32.totalorder %s1458_s26, %s1454_s25  ;;  %p40_p5 = scmp.ge.s32.totalorder %s1892_s19, 2 }
  0x14   : > { %s1863_s20 = scalar_select %p1606_p3, 1, 0 }
  0x15   : > { %p380_p6 = scmp.eq.s32.totalorder %s1193_s17, 3  ;;  %p1196_p7 = scmp.ge.s32.totalorder %s1482_s15, 1 }
  0x16   : > { %1864 = sst [smem:[#allocation14_spill]] %s1863_s20  ;;  %p469_p8 = scmp.lt.s32.totalorder %s1482_s15, 5 }
  0x17   : > { %s1894_s19 = smov (%p40_p5, %s1892_s19), 0  ;;  %p1616_p9 = por %p380_p6, %p379_p4 }
  0x18   : > { %1865 = sst [smem:[#allocation15_spill]] %s1894_s19  ;;  %p470_p10 = pnand %p1196_p7, %p469_p8 }
  0x19   : > { %s1866_s21 = scalar_select %p1616_p9, 1, 0 }
  0x1a   : > { %s360_s22 = ssub.s32 %s1478_s14, %s1894_s19  ;;  %s363_s23 = sadd.s32 1, %s1462_s27 }
  0x1b   : > { %1867 = sst [smem:[#allocation16_spill]] %s1866_s21  ;;  %p361_p11 = scmp.eq.s32.totalorder %s360_s22, 0 }
  0x1c   : > { %473 = sbr.rel (%p470_p10) target bundleno = 1318 (0x526), region = 72  ;;  %s1840_s16 = sand.u32 (!%p470_p10), 1, %s1458_s26  }
  0x1d   : > { %s1624_s24 = scalar_select %p361_p11, %s1462_s27, %s363_s23  }
  0x1e   : > { %p540_p12 = scmp.lt.s32.totalorder (!%p470_p10), %s1470_s29, 1  ;;  %s1630_s17 = sshll.u32 (!%p470_p10), %s1840_s16, 3 }
  0x1f   : > { %1868 = sst [smem:[#allocation17_spill]] %s1624_s24  ;;  %p544_p13 = scmp.lt.s32.totalorder (!%p470_p10), %s1466_s28, 1 }
  0x20   : > { %s1869_s0 = sld [smem:[#allocation18_spill]] (!%p470_p10)  ;;  %s539_s2 = scalar_lea.vmem (!%p470_p10), [#allocation3], %s1630_s17 }
  0x21   : > { %p1203_p0 = scmp.ne.s32.totalorder (!%p470_p10), %s1466_s28, 0 }
  0x23   : > { %s541_s18 = scalar_select %p540_p12, %s1470_s29, 1 }
  0x24   : > { %s1635_s19 = scalar_select %p544_p13, %s1466_s28, 1 }
  0x25   : > { %s1198_s22 = sshll.u32 %s541_s18, 3  ;;  %576 = sbr.rel (%p1203_p0) target bundleno = 44 (0x2c), region = 76  ;;  %vm578_vm0 = vcmask (!%p1203_p0), 261120  }
  0x26   : > { %s543_s30 = scalar_lea.vmem %s1869_s0, %s1198_s22  ;;  %s1231_s13 = sshll.u32 %s1635_s19, 4 }
  0x27   : > { %s1652_s29 = scalar_lea.vmem %s1830_s7, %s1231_s13  ;;  %s557_s1 = scalar_lea.vmem %s1831_s8, %s1635_s19  ;;  %v577_v0 = vld [vmem:[%s543_s30] sm:$0xff] (!%p1203_p0) }
  0x28   : > { %s1232_s14 = sshll.u32 %s1635_s19, 5  ;;  %s565_s24 = scalar_lea.vmem %s1833_s10, %s1635_s19  ;;  %579 = vst.msk [vmem:[#allocation2] sm:$0xff] (!%p1203_p0), %vm578_vm0, %v577_v0 }
  0x29   : > { %s1666_s25 = scalar_lea.vmem %s1832_s9, %s1232_s14  ;;  %s568_s26 = scalar_lea.vmem %s1834_s11, %s1635_s19 }
  0x2a   : > { %s571_s0 = scalar_lea.vmem %s1835_s12, %s1635_s19 }
  0x2c PF: > { %v1372_v1 = vld [vmem:[%s1826_s3] sm:$0xff]   ;;  %v1484_v2 = vmov 0.0   ;;  %v1374_v4 = vld [vmem:[%s1826_s3 + $0x8] sm:$0xff]   ;;  %vm1485_vm1 = vmmov 0   ;;  %vm598_vm2 = vcmask 261120   ;;  %vm704_vm3 = vcmask 1043456   ;;  %s1872_s22 = scalar_lea.vmem %s1828_s5, %s1635_s19  ;;  %s1873_s16 = scalar_lea.vmem %s1829_s6, %s1635_s19 }
  0x2d   : > { %1251 = vmatprep.subr.bf16.mxu0 %v1484_v2  ;;  %1259 = vmatprep.subr.bf16.mxu1 %v1484_v2  ;;  %v1373_v3 = vld [vmem:[%s1827_s4] sm:$0xff]   ;;  %v1375_v5 = vld [vmem:[%s1827_s4 + $0x8] sm:$0xff]   ;;  %s1870_s20 = sld [smem:[#allocation19_spill]]  ;;  %vm700_vm4 = vcmask 64512   ;;  %s1871_s15 = sld [smem:[#allocation20_spill]]  ;;  %v1380_v55 = vld [vmem:[%s1666_s25 + $0x10] sm:$0xff]  }
  0x2e   : > { %1252 = vmatpush3.bf16.msra.mxu0 %v1372_v1  ;;  %1255 = vmatprep.mubr.msk.bf16.mxu0 %vm1485_vm1, %v1484_v2  ;;  %v1376_v35 = vld [vmem:[%s1652_s29] sm:$0xff]   ;;  %v1377_v36 = vld [vmem:[%s1652_s29 + $0x8] sm:$0xff]   ;;  %v1381_v56 = vld [vmem:[%s1666_s25 + $0x18] sm:$0xff]   ;;  %vm947_vm5 = vcmask 523264   ;;  %p1226_p1 = scmp.ne.s32.totalorder %s1466_s28, 1 }
  0x2f   : > { %1260 = vmatpush3.bf16.msra.mxu1 %v1373_v3  ;;  %1253 = vmatprep.subr.bf16.mxu0 %v1484_v2  ;;  %v580_v6 = vld [vmem:[#allocation2] sm:$0xff]  ;;  %v1379_v54 = vld [vmem:[%s1666_s25 + $0x8] sm:$0xff]  }
  0x30   : > { %1261 = vmatprep.subr.bf16.mxu1 %v1484_v2  ;;  %1263 = vmatprep.mubr.msk.bf16.mxu1 %vm1485_vm1, %v1484_v2  ;;  %v581_v7 = vpack.c.bf16 %v580_v6, %v580_v6  ;;  %v1212_v47 = vld [vmem:[%s1872_s22] ss:$0 sm:$0xff] }
  0x31   : > { %v1213_v49 = vld [vmem:[%s1873_s16] ss:$0 sm:$0xff] }
  0x32   : > { %1254 = vmatpush3.bf16.msra.mxu0 %v1374_v4  ;;  %v1378_v53 = vld [vmem:[%s1666_s25] sm:$0xff]  }
  0x33   : > { %1262 = vmatpush3.bf16.msra.mxu1 %v1375_v5  ;;  %1267 = vmatprep.subr.bf16.mxu0 %v1484_v2  ;;  %v698_v20 = vld [vmem:[%s1870_s20] sm:$0xf] }
  0x34   : > { %1273 = vmatprep.subr.bf16.mxu1 %v1484_v2  ;;  %v748_v21 = vld [vmem:[%s1871_s15] sm:$0xf] }
  0x35   : > { %1256 = vmatmul.mubr.msk.bf16.vlgmr.msra.gmra.mrb[0].mxu0 %vm598_vm2, %v581_v7  ;;  %v1214_v57 = vld [vmem:[%s557_s1] ss:$0 sm:$0xff] }
  0x36   : > { %1264 = vmatmul.mubr.msk.bf16.vlgmr.msra.gmra.mrb[0].mxu1 %vm598_vm2, %v581_v7  ;;  %1269 = vmatprep.mubr.msk.bf16.mxu0 %vm1485_vm1, %v1484_v2 }
  0x37   : > { %1275 = vmatprep.mubr.msk.bf16.mxu1 %vm1485_vm1, %v1484_v2 }
 0x108   : > { %v636_v8 = vpop.f32.mrb[0].mxu0 }
 0x109   : > { %v699_v9 = vpack.c.bf16 %v636_v8, %v636_v8  ;;  %v692_v10 = vpop.f32.mrb[0].mxu1  ;;  %v1257_v11 = vpop.f32.mrb[1].mxu0 }
 0x10a   : > { %v749_v12 = vpack.c.bf16 %v692_v10, %v692_v10  ;;  %v1265_v13 = vpop.f32.mrb[1].mxu1  ;;  %v639_v14 = vpop.f32.mrb[2].mxu0 }
 0x10b   : > { %v706_v15 = vsel %vm704_vm3, %v699_v9, 0  ;;  %v695_v16 = vpop.f32.mrb[2].mxu1  ;;  %v1258_v17 = vpop.f32.mrb[3].mxu0  ;;  %v1218_v9 = vld [vmem:[%s565_s24] ss:$0 sm:$0xff] }
 0x10c   : > { %v754_v18 = vsel %vm704_vm3, %v749_v12, 0  ;;  %v1266_v19 = vpop.f32.mrb[3].mxu1  ;;  %1268 = vmatpush3.bf16.msra.mxu0 %v706_v15 }
 0x10d   : > { %1274 = vmatpush3.bf16.msra.mxu1 %v754_v18  ;;  %1279 = vmatprep.subr.bf16.mxu0 %v1484_v2 }
 0x10e   : > { %1287 = vmatprep.subr.bf16.mxu1 %v1484_v2 }
 0x10f   : > { %1270 = vmatmul.mubr.msk.bf16.vlgmr.msra.gmra.mrb[4].mxu0 %vm700_vm4, %v698_v20 }
 0x110   : > { %1276 = vmatmul.mubr.msk.bf16.vlgmr.msra.gmra.mrb[4].mxu1 %vm700_vm4, %v748_v21  ;;  %1283 = vmatprep.mubr.msk.bf16.mxu0 %vm1485_vm1, %v1484_v2 }
 0x111   : > { %1295 = vmatprep.mubr.msk.bf16.mxu1 %vm1485_vm1, %v1484_v2  ;;  %1280 = vmatpush3.bf16.msra.mxu0 %v1376_v35 }
 0x112   : > { %1281 = vmatprep.subr.bf16.mxu0 %v1484_v2  ;;  %1288 = vmatpush3.bf16.msra.mxu1 %v1378_v53 }
 0x113   : > { %1289 = vmatprep.subr.bf16.mxu1 %v1484_v2 }
 0x115   : > { %1282 = vmatpush3.bf16.msra.mxu0 %v1377_v36 }
 0x116   : > { %1290 = vmatpush3.bf16.msra.mxu1 %v1379_v54 }
 0x117   : > { %1291 = vmatprep.subr.bf16.mxu1 %v1484_v2 }
 0x11a   : > { %1292 = vmatpush3.bf16.msra.mxu1 %v1380_v55 }
 0x11b   : > { %1293 = vmatprep.subr.bf16.mxu1 %v1484_v2 }
 0x11e   : > { %1294 = vmatpush3.bf16.msra.mxu1 %v1381_v56 }
 0x1e2   : > { %v742_v22 = vpop.f32.mrb[4].mxu0 }
 0x1e3   : > { %v790_v23 = vpop.f32.mrb[4].mxu1  ;;  %v1271_v24 = vpop.f32.mrb[5].mxu0 }
 0x1e4   : > { %v796_v25 = vsub.f32 %v742_v22, %v790_v23  ;;  %v1277_v26 = vpop.f32.mrb[5].mxu1  ;;  %v745_v27 = vpop.f32.mrb[6].mxu0 }
 0x1e5   : > { %v793_v28 = vpop.f32.mrb[6].mxu1  ;;  %v1272_v29 = vpop.f32.mrb[7].mxu0 }
 0x1e6   : > { %v797_v30 = vadd.f32 %v796_v25, %v580_v6  ;;  %v1278_v31 = vpop.f32.mrb[7].mxu1  ;;  %v1224_v29 = vld [vmem:[%s568_s26] ss:$0 sm:$0xff] }
 0x1e7   : > { %v1225_v31 = vld [vmem:[%s571_s0] ss:$0 sm:$0xff] }
 0x1e8   : > { %v800_v32 = vsel %vm598_vm2, %v797_v30, 0.0  ;;  %v805_v33 = vmul.f32 %v797_v30, %v797_v30 }
 0x1e9   : > { %801 = vadd.xlane.f32.xlu0 %v800_v32 }
 0x1ea   : > { %v806_v34 = vsel %vm598_vm2, %v805_v33, 0.0 }
 0x1ed   : > { %807 = vadd.xlane.f32.xlu0 %v806_v34 }
 0x276   : > { %v802_v37 = vpop.xlane.xlu0 %801 }
 0x277   : > { %v804_v38 = vmul.f32 0.03125, %v802_v37 }
 0x279   : > { %v810_v40 = vmul.f32 %v804_v38, %v804_v38  ;;  %v815_v45 = vsub.f32 %v797_v30, %v804_v38 }
 0x27a   : > { %v808_v39 = vpop.xlane.xlu0 %807 }
 0x27b   : > { %v809_v41 = vmul.f32 0.03125, %v808_v39 }
 0x27d   : > { %v811_v42 = vsub.f32 %v809_v41, %v810_v40 }
 0x27f   : > { %v812_v43 = vmax.f32 %v811_v42, 0.0 }
 0x281   : > { %v813_v44 = vadd.f32 1e-05, %v812_v43 }
 0x283   : > { %1382 = vrsqrt.f32 %v813_v44 }
 0x28d   : > { %v1383_v46 = vpop.eup %1382 }
 0x28e   : > { %v816_v48 = vmul.f32 %v1383_v46, %v815_v45 }
 0x290   : > { %v823_v50 = vmul.f32 %v1212_v47, %v816_v48 }
 0x292   : > { %v830_v51 = vadd.f32 %v1213_v49, %v823_v50 }
 0x294   : > { %v831_v52 = vpack.c.bf16 %v830_v51, %v830_v51 }
 0x296   : > { %1284 = vmatmul.mubr.msk.bf16.vlgmr.msra.gmra.mrb[8].mxu0 %vm598_vm2, %v831_v52 }
 0x369   : > { %v892_v58 = vpop.f32.mrb[8].mxu0 }
 0x36a   : > { %v893_v59 = vadd.f32 %v1214_v57, %v892_v58  ;;  %v1285_v60 = vpop.f32.mrb[9].mxu0 }
 0x36b   : > { %v895_v61 = vpop.f32.mrb[10].mxu0 }
 0x36c   : > { %v899_v62 = vmul.f32 0.044715, %v893_v59  ;;  %v1286_v63 = vpop.f32.mrb[11].mxu0  ;;  %v898_v2 = vmul.f32 0.5, %v893_v59 }
 0x36e   : > { %v900_v0 = vmul.f32 %v899_v62, %v893_v59 }
 0x370   : > { %v901_v1 = vmul.f32 %v900_v0, %v893_v59 }
 0x372   : > { %v902_v3 = vadd.f32 %v901_v1, %v893_v59 }
 0x374   : > { %v903_v4 = vmul.f32 0.7978846, %v902_v3 }
 0x376   : > { %1384 = vtanh.f32 %v903_v4 }
 0x380   : > { %v1385_v5 = vpop.eup %1384 }
 0x381   : > { %v905_v6 = vadd.f32 1.0, %v1385_v5 }
 0x383   : > { %v906_v7 = vmul.f32 %v905_v6, %v898_v2 }
 0x385   : > { %v907_v8 = vpack.c.bf16 %v906_v7, %v906_v7 }
 0x387   : > { %1296 = vmatmul.mubr.msk.bf16.vlgmr.msra.gmra.mrb[8].mxu1 %vm947_vm5, %v907_v8 }
 0x45a   : > { %v985_v10 = vpop.f32.mrb[8].mxu1 }
 0x45b   : > { %v986_v11 = vadd.f32 %v1218_v9, %v985_v10  ;;  %v1297_v12 = vpop.f32.mrb[9].mxu1 }
 0x45c   : > { %v988_v13 = vpop.f32.mrb[10].mxu1 }
 0x45d   : > { %v991_v14 = vadd.f32 %v986_v11, %v830_v51  ;;  %v1298_v15 = vpop.f32.mrb[11].mxu1 }
 0x45f   : > { %v994_v16 = vsel %vm598_vm2, %v991_v14, 0.0  ;;  %v998_v17 = vmul.f32 %v991_v14, %v991_v14 }
 0x460   : > { %995 = vadd.xlane.f32.xlu1 %v994_v16 }
 0x461   : > { %v999_v18 = vsel %vm598_vm2, %v998_v17, 0.0 }
 0x464   : > { %1000 = vadd.xlane.f32.xlu1 %v999_v18 }
 0x4ed   : > { %v996_v19 = vpop.xlane.xlu1 %995 }
 0x4ee   : > { %v997_v20 = vmul.f32 0.03125, %v996_v19 }
 0x4f0   : > { %v1003_v22 = vmul.f32 %v997_v20, %v997_v20  ;;  %v1008_v27 = vsub.f32 %v991_v14, %v997_v20 }
 0x4f1   : > { %v1001_v21 = vpop.xlane.xlu1 %1000 }
 0x4f2   : > { %v1002_v23 = vmul.f32 0.03125, %v1001_v21 }
 0x4f4   : > { %v1004_v24 = vsub.f32 %v1002_v23, %v1003_v22 }
 0x4f6   : > { %v1005_v25 = vmax.f32 %v1004_v24, 0.0 }
 0x4f8   : > { %v1006_v26 = vadd.f32 1e-05, %v1005_v25 }
 0x4fa   : > { %1386 = vrsqrt.f32 %v1006_v26 }
 0x504   : > { %v1387_v28 = vpop.eup %1386 }
 0x505   : > { %v1009_v30 = vmul.f32 %v1387_v28, %v1008_v27  ;;  %1028 = sbr.rel (%p1226_p1) target bundleno = 1292 (0x50c), region = 80 }
 0x507   : > { %v1016_v32 = vmul.f32 %v1224_v29, %v1009_v30 }
 0x509   : > { %v1023_v33 = vadd.f32 %v1225_v31, %v1016_v32 }
 0x50b   : > { %1024 = vst.msk [vmem:[#allocation2] sm:$0xff] %vm598_vm2, %v1023_v33  ;;  %1029 = vst.msk [vmem:[%s539_s2] sm:$0xff] (!%p1226_p1), %vm598_vm2, %v1023_v33 }
 0x50c PF: > { %s1874_s15 = sld [smem:[#allocation9_spill]]  ;;  %s1877_s0 = sld [smem:[#allocation21_spill]] }
 0x50d   : > { %s1875_s26 = sld [smem:[#allocation7_spill]]  ;;  %s1044_s30 = sshll.u32 %s539_s2, 4  ;;  %s1045_s30 = int_to_ptr.vmem [resolvable:$true] %s1044_s30 }
 0x50e   : > { %s1388_s21 = scalar_lea.vmem %s1045_s30, 128  ;;  %s1486_s13 = smov [#allocation3]  }
 0x50f   : > { %p1389_p2 = scmp.ne.s32.totalorder %s1045_s30, %s1388_s21  ;;  %s1392_s1 = sshll.u32 %s1486_s13, 4  ;;  %s1393_s1 = int_to_ptr.vmem [resolvable:$false] %s1392_s1 }
 0x510   : > { %s1394_s25 = scalar_lea.vmem %s1393_s1, 256  ;;  %p1395_p6 = scmp.lt.s32.totalorder %s1045_s30, %s1393_s1 }
 0x511   : > { %p1390_p4 = pnand %p1389_p2, %p1606_p3  ;;  %p1396_p7 = scmp.lt.s32.totalorder %s1394_s25, %s1388_s21 }
 0x512   : > { %s1228_s29 = sshll.u32 %s1874_s15, 7 }
 0x513   : > { %s1772_s23 = scalar_lea.hbm %s1877_s0, %s1228_s29  ;;  %s1878_s28 = sand.u32 1, %s1875_s26  }
 0x514   : > { %s1031_s16 = scalar_lea.sflag [#allocation4], %s1878_s28  ;;  %p1391_p5 = pneg %p1390_p4 }
 0x515   : > { %p1397_p8 = por %p1396_p7, %p1395_p6 }
 0x517   : > { %p1398_p10 = pnand %p1397_p8, %p1391_p5 }
 0x519   : > { %1401 = shalt.err (!%p1398_p10)
}
 0x51a   : > { %s1402_s17 = scalar_lea.hbm %s1772_s23, 128  ;;  %s1406_s20 = scalar_lea.hbm %s1877_s0, 256 }
 0x51b   : > { %p1403_p11 = scmp.ne.s32.totalorder %s1772_s23, %s1402_s17  ;;  %p1407_p0 = scmp.lt.u32.totalorder %s1772_s23, %s1877_s0 }
 0x51c   : > { %p1408_p1 = scmp.lt.u32.totalorder %s1406_s20, %s1402_s17  ;;  %p1410_p4 = scmp.lt.u32.totalorder %s1402_s17, %s1772_s23 }
 0x51d   : > { %p1404_p12 = pnand %p1403_p11, %p1606_p3 }
 0x51e   : > { %p1409_p2 = por %p1408_p1, %p1407_p0 }
 0x51f   : > { %p1405_p13 = pneg %p1404_p12 }
 0x520   : > { %p1411_p5 = por %p1410_p4, %p1409_p2 }
 0x522   : > { %p1412_p6 = pnand %p1411_p5, %p1405_p13 }
 0x524   : > { %1415 = shalt.err (!%p1412_p6)
}
 0x525   : > { %1299 = dma.vmem_to_hbm [thread:$0]  (%p1606_p3), %s1045_s30, 128, %s1772_s23, %s1031_s16  }
 0x526 PF: > { %s1879_s15 = sld [smem:[#allocation12_spill]]  ;;  %s1880_s26 = sld [smem:[#allocation6_spill]] }
 0x52c   : > { %p1305_p7 = scmp.ge.s32.totalorder %s1879_s15, 2  ;;  %s1056_s22 = sand.u32 1, %s1880_s26  }
 0x52d   : > { %s1057_s19 = scalar_lea.sflag [#allocation4], %s1056_s22 }
 0x52e   : > { %p1302_p8 = pnand %p1305_p7, %p1616_p9 }
 0x530   : > { %1449 = dma.done.wait (!%p1302_p8), %s1057_s19, 128  }
 0x531   : > { %1451 = vsyncadd (!%p1302_p8), %s1057_s19, 4294967168  ;;  %s26_s15 = sadd.s32 1, %s1879_s15   ;;  %s1882_s25 = sld [smem:[#allocation7_spill]] }
 0x532   : > { %p23_p10 = scmp.ge.s32.totalorder %s26_s15, 6   ;;  %s1883_s26 = sld [smem:[#allocation8_spill]] }
 0x533   : > { %s1884_s27 = sld [smem:[#allocation17_spill]]  ;;  %s1885_s28 = sld [smem:[#allocation10_spill]] }
 0x534   : > { %s1886_s29 = sld [smem:[#allocation11_spill]]  ;;  %s1887_s30 = sld [smem:[#allocation13_spill]] }
 0x535   : > { %s1888_s14 = sld [smem:[#allocation15_spill]]  ;;  %25 = sbr.rel (!%p23_p10) target bundleno = 10 (0xa), region = 139 }
 0x53c   :  { %1062 = vsyncpa [#allocation4], 1 }
 0x53d   :  { %1064 = vsyncpa [#allocation4 + $0x1], 1 }

</bundles_post_ra>
